<compile_context>
chip_gen: v7x
topology: tpu7x:2x2x1
jax: 0.10.0
libtpu: 0.0.40
codegen_flags: <defaults>
</compile_context>

<pallas_src>
import jax
import jax.numpy as jnp
from jax.experimental import pallas as pl
from jax.experimental.pallas import tpu as pltpu


def _round_up(n, m):
    return ((n + m - 1) // m) * m


def _cdiv(a, b):
    return (a + b - 1) // b


def _make_kernel(matmul_dtype):
    def mlp_kernel(x_ref,
                   w1_ref, b1_ref,
                   w2_ref, b2_ref,
                   w3_ref, b3_ref,
                   w4_ref, b4_ref,
                   o_ref):
        # One (tile_b, in_dim) batch tile; all weights/biases VMEM-resident.
        # 4 matmuls + 3 tanh fused; MXU fed `matmul_dtype`, f32 accumulation,
        # bias-add / tanh in f32.
        b1 = b1_ref[...]
        b2 = b2_ref[...]
        b3 = b3_ref[...]
        b4 = b4_ref[...]

        x = x_ref[...].astype(matmul_dtype)
        h = jnp.tanh(jnp.dot(x, w1_ref[...],
                             preferred_element_type=jnp.float32) + b1)
        h = jnp.tanh(jnp.dot(h.astype(matmul_dtype), w2_ref[...],
                             preferred_element_type=jnp.float32) + b2)
        h = jnp.tanh(jnp.dot(h.astype(matmul_dtype), w3_ref[...],
                             preferred_element_type=jnp.float32) + b3)
        out = jnp.dot(h.astype(matmul_dtype), w4_ref[...],
                      preferred_element_type=jnp.float32) + b4
        o_ref[...] = out.astype(o_ref.dtype)

    return mlp_kernel


def _pad2(a, rows, cols):
    r, c = a.shape
    if (r, c) == (rows, cols):
        return a
    return jnp.pad(a, ((0, rows - r), (0, cols - c)))


def simple_mlp2_forward(x, params, *, max_tile_b=512,
                        matmul_dtype=jnp.float32, lane_multiple=128):
    """x: (B, input_dim) f32. params: W1..W4 stored (in, out), b1..b4 (1, out)."""
    B, in_dim = x.shape
    hidden_dim = params["W1"].shape[1]
    out_dim = params["W4"].shape[1]

    # Lane-dense hidden: zero-pad hidden_dim to a multiple of 128 (exact).
    hidden_pad = _round_up(hidden_dim, lane_multiple)

    # Output width: only pad when it actually helps (out_dim > 128 and not a
    # multiple). Small out_dim keeps a full-width block -> no 16x writeback.
    if out_dim > 128 and out_dim % 128 != 0:
        out_w = _round_up(out_dim, 128)
    else:
        out_w = out_dim

    W1 = _pad2(params["W1"], in_dim, hidden_pad).astype(matmul_dtype)
    b1 = _pad2(params["b1"], 1, hidden_pad).astype(jnp.float32)
    W2 = _pad2(params["W2"], hidden_pad, hidden_pad).astype(matmul_dtype)
    b2 = _pad2(params["b2"], 1, hidden_pad).astype(jnp.float32)
    W3 = _pad2(params["W3"], hidden_pad, hidden_pad).astype(matmul_dtype)
    b3 = _pad2(params["b3"], 1, hidden_pad).astype(jnp.float32)
    W4 = _pad2(params["W4"], hidden_pad, out_w).astype(matmul_dtype)
    b4 = _pad2(params["b4"], 1, out_w).astype(jnp.float32)

    # Balanced batch tiling: multiple of 8 sublanes; >=2 grid steps when B
    # allows it so ("parallel",) shards across both TensorCores on v7x.
    n_tiles = _cdiv(B, max_tile_b)
    if B >= 16:
        n_tiles = max(n_tiles, 2)
    tile_b = _round_up(_cdiv(B, n_tiles), 8)
    n_tiles = _cdiv(B, tile_b)
    B_pad = n_tiles * tile_b
    if B_pad != B:
        x = jnp.pad(x, ((0, B_pad - B), (0, 0)))

    grid = (n_tiles,)
    operands = (x, W1, b1, W2, b2, W3, b3, W4, b4)

    def batch_map(i):
        return (i, 0)

    def const_map(i):
        return (0, 0)

    # x is batch-tiled (auto double-buffered pipeline); weights/biases are
    # single-buffered, VMEM-resident for the whole grid (never re-fetched).
    in_specs = [pl.BlockSpec((tile_b, in_dim), batch_map)]
    in_specs += [pl.BlockSpec(op.shape, const_map, pipeline_mode=pl.Buffered(1))
                 for op in operands[1:]]

    # Explicit scoped-VMEM budget (default scope is only 16 MiB on v5e,
    # 32 MiB on v6e/v7x).
    w_bytes = sum(int(op.size) * op.dtype.itemsize for op in operands[1:])
    io_bytes = 2 * tile_b * (in_dim + out_w) * 4      # double-buffered x / out
    act_bytes = 2 * tile_b * hidden_pad * 4           # compiler-managed h temps
    vmem_limit = int(1.25 * (w_bytes + io_bytes + act_bytes))
    vmem_limit = min(max(vmem_limit, 16 * 1024 * 1024), 64 * 1024 * 1024)

    flops = 2 * B_pad * (in_dim * hidden_pad + 2 * hidden_pad * hidden_pad
                         + hidden_pad * out_w)
    cost = pl.CostEstimate(
        flops=int(flops),
        transcendentals=int(3 * B_pad * hidden_pad),
        bytes_accessed=int(x.size) * 4 + w_bytes + B_pad * out_w * 4)

    out = pl.pallas_call(
        _make_kernel(matmul_dtype),
        out_shape=jax.ShapeDtypeStruct((B_pad, out_w), jnp.float32),
        grid=grid,
        in_specs=in_specs,
        out_specs=pl.BlockSpec((tile_b, out_w), batch_map),
        compiler_params=pltpu.CompilerParams(
            dimension_semantics=("parallel",),
            vmem_limit_bytes=vmem_limit),
        cost_estimate=cost,
    )(*operands)

    if B_pad != B or out_w != out_dim:
        out = out[:B, :out_dim]
    return out


def init_params(key, input_dim, hidden_dim, output_dim):
    """PyTorch nn.Linear-style init U(-1/sqrt(fan_in), 1/sqrt(fan_in)); weights stored (in, out)."""
    dims = [(input_dim, hidden_dim),
            (hidden_dim, hidden_dim),
            (hidden_dim, hidden_dim),
            (hidden_dim, output_dim)]
    params = {}
    for i, (fan_in, fan_out) in enumerate(dims, start=1):
        key, kw, kb = jax.random.split(key, 3)
        bound = 1.0 / jnp.sqrt(jnp.float32(fan_in))
        params[f"W{i}"] = jax.random.uniform(
            kw, (fan_in, fan_out), jnp.float32, minval=-bound, maxval=bound)
        params[f"b{i}"] = jax.random.uniform(
            kb, (1, fan_out), jnp.float32, minval=-bound, maxval=bound)
    return params


def reference_forward(x, params):
    h = jnp.tanh(x @ params["W1"] + params["b1"])
    h = jnp.tanh(h @ params["W2"] + params["b2"])
    h = jnp.tanh(h @ params["W3"] + params["b3"])
    return h @ params["W4"] + params["b4"]


if __name__ == "__main__":
    key = jax.random.PRNGKey(0)
    kx, kp, kx2 = jax.random.split(key, 3)

    batch, input_dim, hidden_dim, output_dim = 8, 16, 32, 8

    x = jax.random.normal(kx, (batch, input_dim), dtype=jnp.float32)
    params = init_params(kp, input_dim, hidden_dim, output_dim)
    ref = reference_forward(x, params)

    # f32 MXU path: matches reference at tight tolerance.
    out = jax.block_until_ready(simple_mlp2_forward(x, params))
    assert out.shape == (batch, output_dim)
    assert jnp.allclose(out, ref, atol=1e-5, rtol=1e-5)

    # Multi-step grid path (>=2 tiles -> megacore-shardable, batch padding).
    x2 = jax.random.normal(kx2, (40, input_dim), dtype=jnp.float32)
    out2 = jax.block_until_ready(simple_mlp2_forward(x2, params))
    ref2 = reference_forward(x2, params)
    assert out2.shape == (40, output_dim)
    assert jnp.allclose(out2, ref2, atol=1e-5, rtol=1e-5)

    # bf16-fed MXU path (f32 accumulation) — looser tolerance expected.
    out_bf16 = jax.block_until_ready(
        simple_mlp2_forward(x, params, matmul_dtype=jnp.bfloat16))
    assert out_bf16.shape == (batch, output_dim)
    assert jnp.allclose(out_bf16, ref, atol=1e-1, rtol=1e-1)

    print("KERNEL_OK")
</pallas_src>

<mosaic_0001>
module attributes {stable_mosaic.version = 11 : i64} {
  func.func @mlp_kernel(%arg0: i32, %arg1: memref<8x16xf32, #tpu.memory_space<vmem>>, %arg2: memref<16x128xf32, #tpu.memory_space<vmem>>, %arg3: memref<1x128xf32, #tpu.memory_space<vmem>>, %arg4: memref<128x128xf32, #tpu.memory_space<vmem>>, %arg5: memref<1x128xf32, #tpu.memory_space<vmem>>, %arg6: memref<128x128xf32, #tpu.memory_space<vmem>>, %arg7: memref<1x128xf32, #tpu.memory_space<vmem>>, %arg8: memref<128x8xf32, #tpu.memory_space<vmem>>, %arg9: memref<1x8xf32, #tpu.memory_space<vmem>>, %arg10: memref<8x8xf32, #tpu.memory_space<vmem>>) attributes {dimension_semantics = [#tpu.dimension_semantics<parallel>], iteration_bounds = array<i64: 1>, scalar_prefetch = 0 : i64, scratch_operands = 0 : i64, tpu.core_type = #tpu.core_type<tc>, window_params = [{transform_indices = @transform_0, window_bounds = array<i64: 8, 16>}, {pipeline_mode = #tpu.pipeline_mode<synchronous>, transform_indices = @transform_1, window_bounds = array<i64: 16, 128>}, {pipeline_mode = #tpu.pipeline_mode<synchronous>, transform_indices = @transform_2, window_bounds = array<i64: 1, 128>}, {pipeline_mode = #tpu.pipeline_mode<synchronous>, transform_indices = @transform_3, window_bounds = array<i64: 128, 128>}, {pipeline_mode = #tpu.pipeline_mode<synchronous>, transform_indices = @transform_4, window_bounds = array<i64: 1, 128>}, {pipeline_mode = #tpu.pipeline_mode<synchronous>, transform_indices = @transform_5, window_bounds = array<i64: 128, 128>}, {pipeline_mode = #tpu.pipeline_mode<synchronous>, transform_indices = @transform_6, window_bounds = array<i64: 1, 128>}, {pipeline_mode = #tpu.pipeline_mode<synchronous>, transform_indices = @transform_7, window_bounds = array<i64: 128, 8>}, {pipeline_mode = #tpu.pipeline_mode<synchronous>, transform_indices = @transform_8, window_bounds = array<i64: 1, 8>}, {transform_indices = @transform_9, window_bounds = array<i64: 8, 8>}]} {
    %c0 = arith.constant 0 : index
    %c0_0 = arith.constant 0 : index
    %0 = vector.load %arg3[%c0, %c0_0] : memref<1x128xf32, #tpu.memory_space<vmem>>, vector<1x128xf32>
    %c0_1 = arith.constant 0 : index
    %c0_2 = arith.constant 0 : index
    %1 = vector.load %arg5[%c0_1, %c0_2] : memref<1x128xf32, #tpu.memory_space<vmem>>, vector<1x128xf32>
    %c0_3 = arith.constant 0 : index
    %c0_4 = arith.constant 0 : index
    %2 = vector.load %arg7[%c0_3, %c0_4] : memref<1x128xf32, #tpu.memory_space<vmem>>, vector<1x128xf32>
    %c0_5 = arith.constant 0 : index
    %c0_6 = arith.constant 0 : index
    %3 = vector.load %arg9[%c0_5, %c0_6] : memref<1x8xf32, #tpu.memory_space<vmem>>, vector<1x8xf32>
    %c0_7 = arith.constant 0 : index
    %c0_8 = arith.constant 0 : index
    %4 = vector.load %arg1[%c0_7, %c0_8] : memref<8x16xf32, #tpu.memory_space<vmem>>, vector<8x16xf32>
    %c0_9 = arith.constant 0 : index
    %c0_10 = arith.constant 0 : index
    %5 = vector.load %arg2[%c0_9, %c0_10] : memref<16x128xf32, #tpu.memory_space<vmem>>, vector<16x128xf32>
    %cst = arith.constant dense<0.000000e+00> : vector<8x128xf32>
    %6 = tpu.matmul %4, %5, %cst {dimension_numbers = #tpu.dot_dimension_numbers<[1], [0], [0], [1], [0, 0, 1, 1], [], []>} : vector<8x16xf32>, vector<16x128xf32>, vector<8x128xf32> -> vector<8x128xf32>
    %7 = vector.broadcast %0 : vector<1x128xf32> to vector<8x128xf32>
    %8 = arith.addf %6, %7 : vector<8x128xf32>
    %9 = math.tanh %8 : vector<8x128xf32>
    %c0_11 = arith.constant 0 : index
    %c0_12 = arith.constant 0 : index
    %10 = vector.load %arg4[%c0_11, %c0_12] : memref<128x128xf32, #tpu.memory_space<vmem>>, vector<128x128xf32>
    %cst_13 = arith.constant dense<0.000000e+00> : vector<8x128xf32>
    %11 = tpu.matmul %9, %10, %cst_13 {dimension_numbers = #tpu.dot_dimension_numbers<[1], [0], [0], [1], [0, 0, 1, 1], [], []>} : vector<8x128xf32>, vector<128x128xf32>, vector<8x128xf32> -> vector<8x128xf32>
    %12 = vector.broadcast %1 : vector<1x128xf32> to vector<8x128xf32>
    %13 = arith.addf %11, %12 : vector<8x128xf32>
    %14 = math.tanh %13 : vector<8x128xf32>
    %c0_14 = arith.constant 0 : index
    %c0_15 = arith.constant 0 : index
    %15 = vector.load %arg6[%c0_14, %c0_15] : memref<128x128xf32, #tpu.memory_space<vmem>>, vector<128x128xf32>
    %cst_16 = arith.constant dense<0.000000e+00> : vector<8x128xf32>
    %16 = tpu.matmul %14, %15, %cst_16 {dimension_numbers = #tpu.dot_dimension_numbers<[1], [0], [0], [1], [0, 0, 1, 1], [], []>} : vector<8x128xf32>, vector<128x128xf32>, vector<8x128xf32> -> vector<8x128xf32>
    %17 = vector.broadcast %2 : vector<1x128xf32> to vector<8x128xf32>
    %18 = arith.addf %16, %17 : vector<8x128xf32>
    %19 = math.tanh %18 : vector<8x128xf32>
    %c0_17 = arith.constant 0 : index
    %c0_18 = arith.constant 0 : index
    %20 = vector.load %arg8[%c0_17, %c0_18] : memref<128x8xf32, #tpu.memory_space<vmem>>, vector<128x8xf32>
    %cst_19 = arith.constant dense<0.000000e+00> : vector<8x8xf32>
    %21 = tpu.matmul %19, %20, %cst_19 {dimension_numbers = #tpu.dot_dimension_numbers<[1], [0], [0], [1], [0, 0, 1, 1], [], []>} : vector<8x128xf32>, vector<128x8xf32>, vector<8x8xf32> -> vector<8x8xf32>
    %22 = vector.broadcast %3 : vector<1x8xf32> to vector<8x8xf32>
    %23 = arith.addf %21, %22 : vector<8x8xf32>
    %c0_20 = arith.constant 0 : index
    %c0_21 = arith.constant 0 : index
    %24 = vector.load %arg10[%c0_20, %c0_21] : memref<8x8xf32, #tpu.memory_space<vmem>>, vector<8x8xf32>
    tpu.vector_store %arg10[%c0_20, %c0_21], %23 {strides = array<i32>} : memref<8x8xf32, #tpu.memory_space<vmem>>, vector<8x8xf32>,
    return
  }
  func.func @transform_0(%arg0: i32) -> (i32, i32) {
    %c0_i32 = arith.constant 0 : i32
    %c0_i32_0 = arith.constant 0 : i32
    return %arg0, %c0_i32 : i32, i32
  }
  func.func @transform_1(%arg0: i32) -> (i32, i32) {
    %c0_i32 = arith.constant 0 : i32
    %c0_i32_0 = arith.constant 0 : i32
    %c0_i32_1 = arith.constant 0 : i32
    return %c0_i32, %c0_i32_0 : i32, i32
  }
  func.func @transform_2(%arg0: i32) -> (i32, i32) {
    %c0_i32 = arith.constant 0 : i32
    %c0_i32_0 = arith.constant 0 : i32
    %c0_i32_1 = arith.constant 0 : i32
    return %c0_i32, %c0_i32_0 : i32, i32
  }
  func.func @transform_3(%arg0: i32) -> (i32, i32) {
    %c0_i32 = arith.constant 0 : i32
    %c0_i32_0 = arith.constant 0 : i32
    %c0_i32_1 = arith.constant 0 : i32
    return %c0_i32, %c0_i32_0 : i32, i32
  }
  func.func @transform_4(%arg0: i32) -> (i32, i32) {
    %c0_i32 = arith.constant 0 : i32
    %c0_i32_0 = arith.constant 0 : i32
    %c0_i32_1 = arith.constant 0 : i32
    return %c0_i32, %c0_i32_0 : i32, i32
  }
  func.func @transform_5(%arg0: i32) -> (i32, i32) {
    %c0_i32 = arith.constant 0 : i32
    %c0_i32_0 = arith.constant 0 : i32
    %c0_i32_1 = arith.constant 0 : i32
    return %c0_i32, %c0_i32_0 : i32, i32
  }
  func.func @transform_6(%arg0: i32) -> (i32, i32) {
    %c0_i32 = arith.constant 0 : i32
    %c0_i32_0 = arith.constant 0 : i32
    %c0_i32_1 = arith.constant 0 : i32
    return %c0_i32, %c0_i32_0 : i32, i32
  }
  func.func @transform_7(%arg0: i32) -> (i32, i32) {
    %c0_i32 = arith.constant 0 : i32
    %c0_i32_0 = arith.constant 0 : i32
    %c0_i32_1 = arith.constant 0 : i32
    return %c0_i32, %c0_i32_0 : i32, i32
  }
  func.func @transform_8(%arg0: i32) -> (i32, i32) {
    %c0_i32 = arith.constant 0 : i32
    %c0_i32_0 = arith.constant 0 : i32
    %c0_i32_1 = arith.constant 0 : i32
    return %c0_i32, %c0_i32_0 : i32, i32
  }
  func.func @transform_9(%arg0: i32) -> (i32, i32) {
    %c0_i32 = arith.constant 0 : i32
    %c0_i32_0 = arith.constant 0 : i32
    return %arg0, %c0_i32 : i32, i32
  }
}

</mosaic_0001>

<bundles_post_ra>
// kernel: tpu_custom_call.1
= control target key start
LH: loop header
LB: loop body
LE: loop exit
PB: predicated region body
PF: predicated region fallthrough
CT: control target
= control target key end

     0   :  { %14 = vsyncpa [#allocation3], 0  ;;  %s1023_s0 = inlined_call_operand.hbm [shape: f32[8,16], index: 0, kind: input, shape index: {}]   ;;  %s1024_s1 = inlined_call_operand.vmem [shape: f32[16,128], index: 1, kind: input, shape index: {}]   ;;  %s1025_s2 = inlined_call_operand.vmem [shape: f32[1,128], index: 2, kind: input, shape index: {}]   ;;  %s1026_s3 = inlined_call_operand.vmem [shape: f32[128,128], index: 3, kind: input, shape index: {}]   ;;  %s1027_s4 = inlined_call_operand.vmem [shape: f32[1,128], index: 4, kind: input, shape index: {}]   ;;  %s1028_s5 = inlined_call_operand.hbm [shape: f32[128,128], index: 5, kind: input, shape index: {}]   ;;  %s1029_s6 = inlined_call_operand.vmem [shape: f32[1,128], index: 6, kind: input, shape index: {}]   ;;  %s1030_s7 = inlined_call_operand.vmem [shape: f32[128,8], index: 7, kind: input, shape index: {}]   ;;  %s1031_s8 = inlined_call_operand.vmem [shape: f32[1,8], index: 8, kind: input, shape index: {}]   ;;  %s1032_s9 = inlined_call_operand.hbm [shape: f32[8,8], index: 9, kind: output, shape index: {}]  }
   0x1   :  { %15 = vsyncpa [#allocation6], 0 }
   0x2   :  { %16 = vsyncpa [#allocation4], 0  ;;  %s775_s30 = smov [#allocation2]   ;;  %s776_s11 = smov [#allocation5]  }
   0x3   :  { %s23_s10 = sshll.u32 %s775_s30, 4  ;;  %s40_s12 = sshll.u32 %s776_s11, 4  ;;  %s24_s10 = int_to_ptr.vmem [resolvable:$true] %s23_s10  ;;  %s833_s12 = int_to_ptr.vmem [resolvable:$true] %s40_s12 }
   0x4   :  { %s703_s15 = scalar_lea.hbm %s1023_s0, 128 }
   0x5   :  { %p704_p0 = scmp.ne.s32.totalorder %s1023_s0, %s703_s15  ;;  %p707_p1 = scmp.lt.u32.totalorder %s703_s15, %s1023_s0 }
   0x7   :  { %p709_p2 = pnand %p707_p1, %p704_p0 }
   0x9   :  { %712 = shalt.err (!%p709_p2)
}
   0xa   :  { %s713_s20 = scalar_lea.vmem %s24_s10, 128  ;;  %p718_p4 = scmp.lt.s32.totalorder %s24_s10, %s24_s10 }
   0xb   :  { %p714_p3 = scmp.ne.s32.totalorder %s24_s10, %s713_s20  ;;  %p719_p5 = scmp.lt.s32.totalorder %s713_s20, %s713_s20 }
   0xd   :  { %p720_p6 = por %p719_p5, %p718_p4 }
   0xf   :  { %p721_p7 = pnand %p720_p6, %p714_p3 }
  0x11   :  { %724 = shalt.err (!%p721_p7)
}
  0x12   :  { %26 = dma.hbm_to_vmem [thread:$0]  %s1023_s0, 128, %s24_s10, [#allocation3]  }
  0x13   :  { %s725_s25 = scalar_lea.hbm %s1028_s5, 2048 }
  0x14   :  { %p726_p8 = scmp.ne.s32.totalorder %s1028_s5, %s725_s25  ;;  %p729_p9 = scmp.lt.u32.totalorder %s725_s25, %s1028_s5 }
  0x16   :  { %p731_p10 = pnand %p729_p9, %p726_p8 }
  0x18   :  { %734 = shalt.err (!%p731_p10)
}
  0x19   :  { %s735_s30 = scalar_lea.vmem %s833_s12, 2048  ;;  %p740_p12 = scmp.lt.s32.totalorder %s833_s12, %s833_s12 }
  0x1a   :  { %p736_p11 = scmp.ne.s32.totalorder %s833_s12, %s735_s30  ;;  %p741_p13 = scmp.lt.s32.totalorder %s735_s30, %s735_s30 }
  0x1c   :  { %p742_p0 = por %p741_p13, %p740_p12 }
  0x1e   :  { %p743_p1 = pnand %p742_p0, %p736_p11 }
  0x20   :  { %746 = shalt.err (!%p743_p1)
}
  0x21   :  { %s777_s0 = smov 128   ;;  %s778_s10 = smov 8  }
  0x22   :  { %46 = dma.hbm_to_vmem [thread:$0]  %s1028_s5, 2048, %s833_s12, [#allocation6], %s777_s0, %s777_s0, %s778_s10  }
  0x23   :  { %769 = dma.done.wait [#allocation3], 128  }
  0x24   :  { %770 = vsyncadd [#allocation3], 4294967168 }
  0x25   :  { %771 = dma.done.wait [#allocation6], 2048  }
  0x26   :  { %772 = vsyncadd [#allocation6], 4294965248  ;;  %v779_v0 = vmov 0.0|0.0   ;;  %vm780_vm0 = vmmov 0   ;;  %v781_v1 = vmov 0.0   ;;  %v64_v2 = vld [vmem:[%s1024_s1] sm:$0xff] }
  0x27   :  { %614 = vmatprep.subr.bf16.mxu0 %v779_v0  ;;  %506 = vmatprep.mubr.msk.f32.mxu0 %vm780_vm0, %v781_v1  ;;  %v65_v3 = vld [vmem:[%s1024_s1 + $0x8] sm:$0xff]  ;;  %v147_v5 = vld [vmem:[%s1026_s3] sm:$0xff]  ;;  %v149_v7 = vld [vmem:[%s1026_s3 + $0x10] sm:$0xff]  ;;  %vm72_vm1 = vcmask 130048   ;;  %vm425_vm2 = vcmask 64512  }
  0x28   :  { %617 = vmatprep.subr.bf16.mxu1 %v779_v0  ;;  %541 = vmatprep.mubr.msk.f32.mxu1 %vm780_vm0, %v781_v1  ;;  %v615_v4 = vpack.c.bf16 %v65_v3, %v64_v2  ;;  %v148_v6 = vld [vmem:[%s1026_s3 + $0x8] sm:$0xff]  ;;  %v150_v9 = vld [vmem:[%s1026_s3 + $0x18] sm:$0xff]  ;;  %v63_v10 = vld [vmem:[#allocation2] sm:$0xff] }
  0x29   :  { %v618_v8 = vpack.c.bf16 %v148_v6, %v147_v5  ;;  %v621_v11 = vpack.c.bf16 %v150_v9, %v149_v7  ;;  %v151_v12 = vld [vmem:[%s1026_s3 + $0x20] sm:$0xff]  ;;  %v152_v13 = vld [vmem:[%s1026_s3 + $0x28] sm:$0xff]  ;;  %v153_v15 = vld [vmem:[%s1026_s3 + $0x30] sm:$0xff] }
  0x2a   :  { %616 = vmatpush3.bf16.msra.mxu0 %v615_v4  ;;  %v624_v14 = vpack.c.bf16 %v152_v13, %v151_v12  ;;  %v154_v16 = vld [vmem:[%s1026_s3 + $0x38] sm:$0xff]  ;;  %v155_v18 = vld [vmem:[%s1026_s3 + $0x40] sm:$0xff]  ;;  %v156_v19 = vld [vmem:[%s1026_s3 + $0x48] sm:$0xff] }
  0x2b   :  { %619 = vmatpush3.bf16.msra.mxu1 %v618_v8  ;;  %641 = vmatprep.subr.bf16.mxu0 %v779_v0  ;;  %v627_v17 = vpack.c.bf16 %v154_v16, %v153_v15  ;;  %v630_v20 = vpack.c.bf16 %v156_v19, %v155_v18  ;;  %v157_v21 = vld [vmem:[%s1026_s3 + $0x50] sm:$0xff]  ;;  %v158_v22 = vld [vmem:[%s1026_s3 + $0x58] sm:$0xff]  ;;  %v159_v24 = vld [vmem:[%s1026_s3 + $0x60] sm:$0xff] }
  0x2c   :  { %620 = vmatprep.subr.bf16.mxu1 %v779_v0  ;;  %v633_v23 = vpack.c.bf16 %v158_v22, %v157_v21  ;;  %v160_v25 = vld [vmem:[%s1026_s3 + $0x68] sm:$0xff]  ;;  %v161_v27 = vld [vmem:[%s1026_s3 + $0x70] sm:$0xff]  ;;  %v162_v28 = vld [vmem:[%s1026_s3 + $0x78] sm:$0xff] }
  0x2d   :  { %507 = vmatmul.mubr.msk.f32.vlgmr.msra.gmra.mrb[0].mxu0 %vm72_vm1, %v63_v10  ;;  %v636_v26 = vpack.c.bf16 %v160_v25, %v159_v24  ;;  %v639_v29 = vpack.c.bf16 %v162_v28, %v161_v27  ;;  %v240_v30 = vld [vmem:[#allocation5] sm:$0xff]  ;;  %v241_v31 = vld [vmem:[#allocation5 + $0x8] sm:$0xff]  ;;  %v242_v32 = vld [vmem:[#allocation5 + $0x10] sm:$0xff] }
  0x2e   :  { %576 = vmatprep.mubr.msk.f32.mxu0 %vm780_vm0, %v781_v1  ;;  %v642_v33 = vpack.c.bf16 %v241_v31, %v240_v30  ;;  %v243_v34 = vld [vmem:[#allocation5 + $0x18] sm:$0xff]  ;;  %v244_v36 = vld [vmem:[#allocation5 + $0x20] sm:$0xff]  ;;  %v245_v37 = vld [vmem:[#allocation5 + $0x28] sm:$0xff] }
  0x2f   :  { %622 = vmatpush3.bf16.msra.mxu1 %v621_v11  ;;  %v645_v35 = vpack.c.bf16 %v243_v34, %v242_v32  ;;  %v648_v38 = vpack.c.bf16 %v245_v37, %v244_v36  ;;  %v246_v39 = vld [vmem:[#allocation5 + $0x30] sm:$0xff]  ;;  %v247_v40 = vld [vmem:[#allocation5 + $0x38] sm:$0xff]  ;;  %v248_v42 = vld [vmem:[#allocation5 + $0x40] sm:$0xff] }
  0x30   :  { %623 = vmatprep.subr.bf16.mxu1 %v779_v0  ;;  %643 = vmatpush3.bf16.msra.mxu0 %v642_v33  ;;  %v651_v41 = vpack.c.bf16 %v247_v40, %v246_v39  ;;  %v249_v43 = vld [vmem:[#allocation5 + $0x48] sm:$0xff]  ;;  %v443_v45 = vld [vmem:[%s1025_s2] ss:$0 sm:$0xff]  ;;  %v250_v50 = vld [vmem:[#allocation5 + $0x50] sm:$0xff] }
  0x31   :  { %644 = vmatprep.subr.bf16.mxu0 %v779_v0  ;;  %v654_v44 = vpack.c.bf16 %v249_v43, %v248_v42  ;;  %v251_v51 = vld [vmem:[#allocation5 + $0x58] sm:$0xff]  ;;  %v252_v53 = vld [vmem:[#allocation5 + $0x60] sm:$0xff]  ;;  %v253_v54 = vld [vmem:[#allocation5 + $0x68] sm:$0xff] }
  0x32   :  { %v657_v52 = vpack.c.bf16 %v251_v51, %v250_v50  ;;  %v660_v55 = vpack.c.bf16 %v253_v54, %v252_v53  ;;  %v254_v56 = vld [vmem:[#allocation5 + $0x70] sm:$0xff]  ;;  %v255_v57 = vld [vmem:[#allocation5 + $0x78] sm:$0xff]  ;;  %v334_v60 = vld [vmem:[%s1030_s7 + $0x8] sm:$0xff] }
  0x33   :  { %625 = vmatpush3.bf16.msra.mxu1 %v624_v14  ;;  %v663_v58 = vpack.c.bf16 %v255_v57, %v254_v56  ;;  %v333_v59 = vld [vmem:[%s1030_s7] sm:$0xff]  ;;  %v335_v61 = vld [vmem:[%s1030_s7 + $0x10] sm:$0xff]  ;;  %v336_v63 = vld [vmem:[%s1030_s7 + $0x18] sm:$0xff] }
  0x34   :  { %626 = vmatprep.subr.bf16.mxu1 %v779_v0  ;;  %646 = vmatpush3.bf16.msra.mxu0 %v645_v35  ;;  %v666_v62 = vpack.c.bf16 %v334_v60, %v333_v59  ;;  %v337_v2 = vld [vmem:[%s1030_s7 + $0x20] sm:$0xff]  ;;  %v338_v3 = vld [vmem:[%s1030_s7 + $0x28] sm:$0xff]  ;;  %v339_v5 = vld [vmem:[%s1030_s7 + $0x30] sm:$0xff] }
  0x35   :  { %647 = vmatprep.subr.bf16.mxu0 %v779_v0  ;;  %v672_v4 = vpack.c.bf16 %v338_v3, %v337_v2  ;;  %v340_v6 = vld [vmem:[%s1030_s7 + $0x38] sm:$0xff]  ;;  %v341_v8 = vld [vmem:[%s1030_s7 + $0x40] sm:$0xff]  ;;  %v342_v9 = vld [vmem:[%s1030_s7 + $0x48] sm:$0xff] }
  0x36   :  { %v675_v7 = vpack.c.bf16 %v340_v6, %v339_v5  ;;  %v678_v10 = vpack.c.bf16 %v342_v9, %v341_v8  ;;  %v445_v11 = vld [vmem:[%s1027_s4] ss:$0 sm:$0xff]  ;;  %v343_v16 = vld [vmem:[%s1030_s7 + $0x50] sm:$0xff] }
  0x37   :  { %628 = vmatpush3.bf16.msra.mxu1 %v627_v17  ;;  %v344_v17 = vld [vmem:[%s1030_s7 + $0x58] sm:$0xff]  ;;  %v345_v19 = vld [vmem:[%s1030_s7 + $0x60] sm:$0xff]  ;;  %v347_v22 = vld [vmem:[%s1030_s7 + $0x70] sm:$0xff] }
  0x38   :  { %629 = vmatprep.subr.bf16.mxu1 %v779_v0  ;;  %649 = vmatpush3.bf16.msra.mxu0 %v648_v38  ;;  %v681_v18 = vpack.c.bf16 %v344_v17, %v343_v16  ;;  %v446_v25 = vld [vmem:[%s1029_s6] ss:$0 sm:$0xff] }
  0x39   :  { %650 = vmatprep.subr.bf16.mxu0 %v779_v0  ;;  %v447_v30 = vld [vmem:[%s1031_s8] ss:$0 sm:$0xff] }
  0x3b   :  { %631 = vmatpush3.bf16.msra.mxu1 %v630_v20  ;;  %v346_v20 = vld [vmem:[%s1030_s7 + $0x68] sm:$0xff] }
  0x3c   :  { %632 = vmatprep.subr.bf16.mxu1 %v779_v0  ;;  %652 = vmatpush3.bf16.msra.mxu0 %v651_v41  ;;  %v684_v21 = vpack.c.bf16 %v346_v20, %v345_v19 }
  0x3d   :  { %653 = vmatprep.subr.bf16.mxu0 %v779_v0 }
  0x3f   :  { %634 = vmatpush3.bf16.msra.mxu1 %v633_v23  ;;  %v348_v23 = vld [vmem:[%s1030_s7 + $0x78] sm:$0xff]  ;;  %s782_s7 = smov [#allocation7]  }
  0x40   :  { %635 = vmatprep.subr.bf16.mxu1 %v779_v0  ;;  %655 = vmatpush3.bf16.msra.mxu0 %v654_v44  ;;  %v687_v24 = vpack.c.bf16 %v348_v23, %v347_v22  ;;  %s433_s13 = sshll.u32 %s782_s7, 4  ;;  %s434_s13 = int_to_ptr.vmem [resolvable:$true] %s433_s13 }
  0x41   :  { %656 = vmatprep.subr.bf16.mxu0 %v779_v0  ;;  %s747_s14 = scalar_lea.vmem %s434_s13, 128  ;;  %p752_p3 = scmp.lt.s32.totalorder %s434_s13, %s434_s13 }
  0x42   :  { %p748_p2 = scmp.ne.s32.totalorder %s434_s13, %s747_s14  ;;  %p753_p4 = scmp.lt.s32.totalorder %s747_s14, %s747_s14 }
  0x43   :  { %637 = vmatpush3.bf16.msra.mxu1 %v636_v26 }
  0x44   :  { %638 = vmatprep.subr.bf16.mxu1 %v779_v0  ;;  %658 = vmatpush3.bf16.msra.mxu0 %v657_v52  ;;  %p754_p5 = por %p753_p4, %p752_p3 }
  0x45   :  { %659 = vmatprep.subr.bf16.mxu0 %v779_v0 }
  0x46   :  { %p755_p6 = pnand %p754_p5, %p748_p2 }
  0x47   :  { %640 = vmatpush3.bf16.msra.mxu1 %v639_v29 }
  0x48   :  { %665 = vmatprep.subr.bf16.mxu1 %v779_v0  ;;  %661 = vmatpush3.bf16.msra.mxu0 %v660_v55 }
  0x49   :  { %662 = vmatprep.subr.bf16.mxu0 %v779_v0 }
  0x4c   :  { %664 = vmatpush3.bf16.msra.mxu0 %v663_v58 }
 0x100   :  { %v142_v46 = vpop.f32.mrb[0].mxu0 }
 0x101   :  { %v143_v47 = vadd.f32 %v443_v45, %v142_v46  ;;  %v508_v48 = vpop.f32.mrb[1].mxu0 }
 0x103   :  { %697 = vtanh.f32 %v143_v47 }
 0x10d   :  { %v698_v49 = vpop.eup %697 }
 0x10e   :  { %542 = vmatmul.mubr.f32.vlgmr.msra.gmra.mrb[0].mxu1 %v698_v49 }
 0x10f   :  { %611 = vmatprep.mubr.msk.f32.mxu1 %vm780_vm0, %v781_v1  ;;  %667 = vmatpush3.bf16.msra.mxu1 %v666_v62  ;;  %v669_v1 = vpack.c.bf16 %v336_v63, %v335_v61 }
 0x110   :  { %668 = vmatprep.subr.bf16.mxu1 %v779_v0 }
 0x113   :  { %670 = vmatpush3.bf16.msra.mxu1 %v669_v1 }
 0x114   :  { %671 = vmatprep.subr.bf16.mxu1 %v779_v0 }
 0x117   :  { %673 = vmatpush3.bf16.msra.mxu1 %v672_v4 }
 0x118   :  { %674 = vmatprep.subr.bf16.mxu1 %v779_v0 }
 0x11b   :  { %676 = vmatpush3.bf16.msra.mxu1 %v675_v7 }
 0x11c   :  { %677 = vmatprep.subr.bf16.mxu1 %v779_v0 }
 0x11f   :  { %679 = vmatpush3.bf16.msra.mxu1 %v678_v10 }
 0x120   :  { %680 = vmatprep.subr.bf16.mxu1 %v779_v0 }
 0x123   :  { %682 = vmatpush3.bf16.msra.mxu1 %v681_v18 }
 0x124   :  { %683 = vmatprep.subr.bf16.mxu1 %v779_v0 }
 0x127   :  { %685 = vmatpush3.bf16.msra.mxu1 %v684_v21 }
 0x128   :  { %686 = vmatprep.subr.bf16.mxu1 %v779_v0 }
 0x12b   :  { %688 = vmatpush3.bf16.msra.mxu1 %v687_v24 }
 0x1e1   :  { %v235_v12 = vpop.f32.mrb[0].mxu1 }
 0x1e2   :  { %v236_v13 = vadd.f32 %v445_v11, %v235_v12  ;;  %v543_v14 = vpop.f32.mrb[1].mxu1 }
 0x1e4   :  { %699 = vtanh.f32 %v236_v13 }
 0x1ee   :  { %v700_v15 = vpop.eup %699 }
 0x1ef   :  { %577 = vmatmul.mubr.f32.vlgmr.msra.gmra.mrb[2].mxu0 %v700_v15 }
 0x2c2   :  { %v328_v26 = vpop.f32.mrb[2].mxu0 }
 0x2c3   :  { %v329_v27 = vadd.f32 %v446_v25, %v328_v26  ;;  %v578_v28 = vpop.f32.mrb[3].mxu0 }
 0x2c5   :  { %701 = vtanh.f32 %v329_v27 }
 0x2cf   :  { %v702_v29 = vpop.eup %701 }
 0x2d0   :  { %612 = vmatmul.mubr.f32.vlgmr.msra.gmra.mrb[2].mxu1 %v702_v29 }
 0x3a3   :  { %v421_v31 = vpop.f32.mrb[2].mxu1 }
 0x3a4   :  { %v422_v0 = vadd.f32 %v447_v30, %v421_v31  ;;  %v613_v32 = vpop.f32.mrb[3].mxu1 }
 0x3a6   :  { %426 = vst.msk [vmem:[#allocation7] sm:$0xff] %vm425_vm2, %v422_v0 }
 0x3a7   :  { %758 = shalt.err (!%p755_p6)
}
 0x3a8   :  { %s759_s5 = scalar_lea.hbm %s1032_s9, 128 }
 0x3a9   :  { %p760_p7 = scmp.ne.s32.totalorder %s1032_s9, %s759_s5  ;;  %p763_p8 = scmp.lt.u32.totalorder %s759_s5, %s1032_s9 }
 0x3ab   :  { %p765_p9 = pnand %p763_p8, %p760_p7 }
 0x3ad   :  { %768 = shalt.err (!%p765_p9)
}
 0x3ae   :  { %436 = dma.vmem_to_hbm [thread:$0]  %s434_s13, 128, %s1032_s9, [#allocation4]  }
 0x3af   :  { %773 = dma.done.wait [#allocation4], 128  }
 0x3b0   :  { %774 = vsyncadd [#allocation4], 4294967168 }
 0x3b1   :  { %440 = vsyncpa [#allocation3], 1 }
 0x3b2   :  { %441 = vsyncpa [#allocation6], 1 }
 0x3b3   :  { %442 = vsyncpa [#allocation4], 1 }

</bundles_post_ra>
